<compile_context>
chip_gen: v7x
topology: tpu7x:2x2x1
jax: 0.10.0
libtpu: 0.0.40
codegen_flags: <defaults>
</compile_context>

<pallas_src>
import functools
import math

import jax
import jax.numpy as jnp
from jax.experimental import pallas as pl
from jax.experimental.pallas import tpu as pltpu


def _round_up(n, m):
    return ((n + m - 1) // m) * m


def _leaky_relu(v, negative_slope=0.2):
    return jnp.where(v >= 0, v, negative_slope * v)


def _choose_batch_tiling(B):
    """Return (batch_tile, padded_batch).

    B <= 512      -> single tile (rounded up to a sublane multiple of 8).
    B  > 512      -> at least 2 grid steps (v7x megacore), tiles <= 2048 rows,
                     padding limited to sublane rounding of the last tile.
    """
    B8 = _round_up(max(B, 8), 8)
    if B8 <= 512:
        return B8, B8
    n_tiles = max(2, math.ceil(B8 / 2048))
    bt = _round_up(math.ceil(B8 / n_tiles), 8)
    return bt, bt * n_tiles


def decoder_vae_kernel(
    x_ref,
    w1_ref, b1_ref,
    w2_ref, b2_ref,
    w3_ref, b3_ref,
    w4_ref, b4_ref,
    out_ref,
):
    # Cast x to bf16 *inside* the kernel (free VPU work hidden under MXU/DMA);
    # avoids a standalone HBM->HBM convert pass in the wrapper.
    x = x_ref[...].astype(jnp.bfloat16)

    # Layer 1: Linear(in -> H1p) + LeakyReLU(0.2).  bf16 MXU operands, f32 acc.
    h = jnp.dot(x, w1_ref[...], preferred_element_type=jnp.float32) + b1_ref[...]
    h = _leaky_relu(h)

    # Layer 2: Linear(H1p -> H2p) + LeakyReLU(0.2)
    h = jnp.dot(h.astype(jnp.bfloat16), w2_ref[...],
                preferred_element_type=jnp.float32) + b2_ref[...]
    h = _leaky_relu(h)

    # Layer 3: Linear(H2p -> H3p) + LeakyReLU(0.2)
    h = jnp.dot(h.astype(jnp.bfloat16), w3_ref[...],
                preferred_element_type=jnp.float32) + b3_ref[...]
    h = _leaky_relu(h)

    # Layer 4: Linear(H3p -> out_features), no activation
    h = jnp.dot(h.astype(jnp.bfloat16), w4_ref[...],
                preferred_element_type=jnp.float32) + b4_ref[...]

    out_ref[...] = h.astype(out_ref.dtype)


def prepare_decoder_params(params):
    """One-time parameter prep (call OUTSIDE the jitted forward).

    * Casts matmul operands (weights) to bf16 once (native MXU path, half the
      weight DMA); biases stay f32 so bias-add + LeakyReLU run in f32.
    * Zero-pads the narrow hidden widths (e.g. 32 / 64) up to multiples of 128
      lanes so every intermediate activation tile is lane-dense.  Padding with
      zeros is mathematically exact: padded activation columns are exactly 0
      through bias/LeakyReLU and multiply only zero weight rows downstream.
    """
    def pad2d(a, rows, cols):
        r, c = a.shape
        return jnp.pad(a, ((0, rows - r), (0, cols - c)))

    w = {i: jnp.asarray(params[f"w{i}"], jnp.float32) for i in range(1, 5)}
    b = {i: jnp.asarray(params[f"b{i}"], jnp.float32).reshape(1, -1)
         for i in range(1, 5)}

    in_features = w[1].shape[0]
    h1p = _round_up(w[1].shape[1], 128)
    h2p = _round_up(w[2].shape[1], 128)
    h3p = _round_up(w[3].shape[1], 128)
    out_features = w[4].shape[1]

    return {
        "w1": pad2d(w[1], in_features, h1p).astype(jnp.bfloat16),
        "b1": pad2d(b[1], 1, h1p),
        "w2": pad2d(w[2], h1p, h2p).astype(jnp.bfloat16),
        "b2": pad2d(b[2], 1, h2p),
        "w3": pad2d(w[3], h2p, h3p).astype(jnp.bfloat16),
        "b3": pad2d(b[3], 1, h3p),
        "w4": pad2d(w[4], h3p, out_features).astype(jnp.bfloat16),
        "b4": b[4],
    }


@jax.jit
def decoder_vae_forward(x, prepared):
    """x: (B, in_features) f32.  prepared: output of prepare_decoder_params()."""
    B, in_features = x.shape
    out_features = prepared["w4"].shape[1]

    bt, b_pad = _choose_batch_tiling(B)
    if b_pad != B:
        # Padding bounded by < bt extra rows (and typically < 8/tile); x stays f32.
        x = jnp.pad(x, ((0, b_pad - B), (0, 0)))

    operands = (
        x,
        prepared["w1"], prepared["b1"],
        prepared["w2"], prepared["b2"],
        prepared["w3"], prepared["b3"],
        prepared["w4"], prepared["b4"],
    )

    # x/out tiled over batch; weights & biases VMEM-resident (constant index map,
    # fetched once across the whole grid).
    in_specs = [pl.BlockSpec((bt, in_features), lambda i: (i, 0))]
    for arr in operands[1:]:
        in_specs.append(pl.BlockSpec(arr.shape, lambda i: (0, 0)))
    out_spec = pl.BlockSpec((bt, out_features), lambda i: (i, 0))

    h1p = prepared["w1"].shape[1]
    h2p = prepared["w2"].shape[1]
    h3p = prepared["w3"].shape[1]
    flops = 2 * b_pad * (in_features * h1p + h1p * h2p + h2p * h3p
                         + h3p * out_features)
    bytes_accessed = (
        b_pad * in_features * 4          # f32 x in
        + b_pad * out_features * 4       # f32 out
        + sum(int(a.size) * a.dtype.itemsize for a in operands[1:])
    )

    out = pl.pallas_call(
        decoder_vae_kernel,
        out_shape=jax.ShapeDtypeStruct((b_pad, out_features), jnp.float32),
        grid=(b_pad // bt,),
        in_specs=in_specs,
        out_specs=out_spec,
        compiler_params=pltpu.CompilerParams(
            # Batch axis independent -> shards across v7x's 2 TensorCores
            # (no-op on single-TC v5e/v6e).
            dimension_semantics=("parallel",),
            # Headroom for 2048-row double-buffered tiles on every generation
            # (48 MiB <= v7x's 64 MiB physical VMEM).
            vmem_limit_bytes=48 * 1024 * 1024,
        ),
        cost_estimate=pl.CostEstimate(
            flops=flops, transcendentals=0, bytes_accessed=bytes_accessed
        ),
    )(*operands)

    if b_pad != B:
        out = out[:B]
    return out


def init_decoder_vae_params(key, in_features, out_features):
    """Deterministic init mirroring nn.Linear default: U(-1/sqrt(fan_in), 1/sqrt(fan_in))."""
    h3 = out_features // 2
    h2 = h3 // 2
    h1 = h2 // 2
    dims = [(in_features, h1), (h1, h2), (h2, h3), (h3, out_features)]
    params = {}
    for i, (fan_in, fan_out) in enumerate(dims, start=1):
        key, kw, kb = jax.random.split(key, 3)
        bound = 1.0 / jnp.sqrt(jnp.float32(fan_in))
        # Stored as (fan_in, fan_out) == PyTorch weight.T
        params[f"w{i}"] = jax.random.uniform(
            kw, (fan_in, fan_out), jnp.float32, minval=-bound, maxval=bound
        )
        params[f"b{i}"] = jax.random.uniform(
            kb, (1, fan_out), jnp.float32, minval=-bound, maxval=bound
        )
    return params


def decoder_vae_ref_bf16(x, params):
    """Pure-JAX reference matching the kernel's bf16-operand / f32-accumulate math."""
    h = x.astype(jnp.float32)
    for i in range(1, 5):
        w_bf16 = params[f"w{i}"].astype(jnp.bfloat16)
        h = jnp.dot(h.astype(jnp.bfloat16), w_bf16,
                    preferred_element_type=jnp.float32) + params[f"b{i}"]
        if i < 4:
            h = jnp.where(h >= 0, h, 0.2 * h)
    return h


def decoder_vae_ref_f32(x, params):
    """Full-precision reference (loose sanity check only)."""
    h = x
    for i in range(1, 5):
        h = h @ params[f"w{i}"] + params[f"b{i}"]
        if i < 4:
            h = jnp.where(h >= 0, h, 0.2 * h)
    return h


if __name__ == "__main__":
    # Small shapes consistent with the module: latent=32, out_features=256
    # -> hidden sizes 32 / 64 / 128 / 256.
    in_features = 32
    out_features = 256
    batch = 8

    key = jax.random.PRNGKey(0)
    key, kx = jax.random.split(key)
    x = jax.random.normal(kx, (batch, in_features), dtype=jnp.float32)
    params = init_decoder_vae_params(key, in_features, out_features)

    # One-time param prep (bf16 cast + lane padding), outside the jitted forward.
    prepared = prepare_decoder_params(params)

    out = decoder_vae_forward(x, prepared)
    out = jax.block_until_ready(out)
    assert out.shape == (batch, out_features), out.shape

    # Tight check vs bf16-matmul / f32-accumulate reference (same math as kernel;
    # zero lane-padding is exact, so unpadded reference applies).
    ref_bf16 = decoder_vae_ref_bf16(x, params)
    assert jnp.allclose(out, ref_bf16, atol=1e-2, rtol=1e-2), float(
        jnp.max(jnp.abs(out - ref_bf16))
    )

    # Loose sanity check vs full-f32 reference (bf16 operand rounding error).
    ref_f32 = decoder_vae_ref_f32(x, params)
    assert jnp.allclose(out, ref_f32, atol=5e-2, rtol=5e-2), float(
        jnp.max(jnp.abs(out - ref_f32))
    )

    print("KERNEL_OK")
</pallas_src>

<mosaic_0001>
module attributes {stable_mosaic.version = 11 : i64} {
  func.func @decoder_vae_kernel(%arg0: i32, %arg1: memref<8x32xf32, #tpu.memory_space<vmem>>, %arg2: memref<32x128xbf16, #tpu.memory_space<vmem>>, %arg3: memref<1x128xf32, #tpu.memory_space<vmem>>, %arg4: memref<128x128xbf16, #tpu.memory_space<vmem>>, %arg5: memref<1x128xf32, #tpu.memory_space<vmem>>, %arg6: memref<128x128xbf16, #tpu.memory_space<vmem>>, %arg7: memref<1x128xf32, #tpu.memory_space<vmem>>, %arg8: memref<128x256xbf16, #tpu.memory_space<vmem>>, %arg9: memref<1x256xf32, #tpu.memory_space<vmem>>, %arg10: memref<8x256xf32, #tpu.memory_space<vmem>>) attributes {dimension_semantics = [#tpu.dimension_semantics<parallel>], iteration_bounds = array<i64: 1>, scalar_prefetch = 0 : i64, scratch_operands = 0 : i64, tpu.core_type = #tpu.core_type<tc>, window_params = [{transform_indices = @transform_0, window_bounds = array<i64: 8, 32>}, {pipeline_mode = #tpu.pipeline_mode<synchronous>, transform_indices = @transform_1, window_bounds = array<i64: 32, 128>}, {pipeline_mode = #tpu.pipeline_mode<synchronous>, transform_indices = @transform_2, window_bounds = array<i64: 1, 128>}, {pipeline_mode = #tpu.pipeline_mode<synchronous>, transform_indices = @transform_3, window_bounds = array<i64: 128, 128>}, {pipeline_mode = #tpu.pipeline_mode<synchronous>, transform_indices = @transform_4, window_bounds = array<i64: 1, 128>}, {pipeline_mode = #tpu.pipeline_mode<synchronous>, transform_indices = @transform_5, window_bounds = array<i64: 128, 128>}, {pipeline_mode = #tpu.pipeline_mode<synchronous>, transform_indices = @transform_6, window_bounds = array<i64: 1, 128>}, {pipeline_mode = #tpu.pipeline_mode<synchronous>, transform_indices = @transform_7, window_bounds = array<i64: 128, 256>}, {pipeline_mode = #tpu.pipeline_mode<synchronous>, transform_indices = @transform_8, window_bounds = array<i64: 1, 256>}, {transform_indices = @transform_9, window_bounds = array<i64: 8, 256>}]} {
    %c0 = arith.constant 0 : index
    %c0_0 = arith.constant 0 : index
    %0 = vector.load %arg1[%c0, %c0_0] : memref<8x32xf32, #tpu.memory_space<vmem>>, vector<8x32xf32>
    %1 = arith.truncf %0 : vector<8x32xf32> to vector<8x32xbf16>
    %c0_1 = arith.constant 0 : index
    %c0_2 = arith.constant 0 : index
    %2 = vector.load %arg2[%c0_1, %c0_2] : memref<32x128xbf16, #tpu.memory_space<vmem>>, vector<32x128xbf16>
    %cst = arith.constant dense<0.000000e+00> : vector<8x128xf32>
    %3 = tpu.matmul %1, %2, %cst {dimension_numbers = #tpu.dot_dimension_numbers<[1], [0], [0], [1], [0, 0, 1, 1], [], []>} : vector<8x32xbf16>, vector<32x128xbf16>, vector<8x128xf32> -> vector<8x128xf32>
    %c0_3 = arith.constant 0 : index
    %c0_4 = arith.constant 0 : index
    %4 = vector.load %arg3[%c0_3, %c0_4] : memref<1x128xf32, #tpu.memory_space<vmem>>, vector<1x128xf32>
    %5 = vector.broadcast %4 : vector<1x128xf32> to vector<8x128xf32>
    %6 = arith.addf %3, %5 : vector<8x128xf32>
    %cst_5 = arith.constant 0.000000e+00 : f32
    %7 = vector.broadcast %cst_5 : f32 to vector<8x128xf32>
    %8 = arith.cmpf oge, %6, %7 : vector<8x128xf32>
    %cst_6 = arith.constant 2.000000e-01 : f32
    %9 = vector.broadcast %cst_6 : f32 to vector<8x128xf32>
    %10 = arith.mulf %9, %6 : vector<8x128xf32>
    %11 = arith.select %8, %6, %10 : vector<8x128xi1>, vector<8x128xf32>
    %12 = arith.truncf %11 : vector<8x128xf32> to vector<8x128xbf16>
    %c0_7 = arith.constant 0 : index
    %c0_8 = arith.constant 0 : index
    %13 = vector.load %arg4[%c0_7, %c0_8] : memref<128x128xbf16, #tpu.memory_space<vmem>>, vector<128x128xbf16>
    %cst_9 = arith.constant dense<0.000000e+00> : vector<8x128xf32>
    %14 = tpu.matmul %12, %13, %cst_9 {dimension_numbers = #tpu.dot_dimension_numbers<[1], [0], [0], [1], [0, 0, 1, 1], [], []>} : vector<8x128xbf16>, vector<128x128xbf16>, vector<8x128xf32> -> vector<8x128xf32>
    %c0_10 = arith.constant 0 : index
    %c0_11 = arith.constant 0 : index
    %15 = vector.load %arg5[%c0_10, %c0_11] : memref<1x128xf32, #tpu.memory_space<vmem>>, vector<1x128xf32>
    %16 = vector.broadcast %15 : vector<1x128xf32> to vector<8x128xf32>
    %17 = arith.addf %14, %16 : vector<8x128xf32>
    %cst_12 = arith.constant 0.000000e+00 : f32
    %18 = vector.broadcast %cst_12 : f32 to vector<8x128xf32>
    %19 = arith.cmpf oge, %17, %18 : vector<8x128xf32>
    %cst_13 = arith.constant 2.000000e-01 : f32
    %20 = vector.broadcast %cst_13 : f32 to vector<8x128xf32>
    %21 = arith.mulf %20, %17 : vector<8x128xf32>
    %22 = arith.select %19, %17, %21 : vector<8x128xi1>, vector<8x128xf32>
    %23 = arith.truncf %22 : vector<8x128xf32> to vector<8x128xbf16>
    %c0_14 = arith.constant 0 : index
    %c0_15 = arith.constant 0 : index
    %24 = vector.load %arg6[%c0_14, %c0_15] : memref<128x128xbf16, #tpu.memory_space<vmem>>, vector<128x128xbf16>
    %cst_16 = arith.constant dense<0.000000e+00> : vector<8x128xf32>
    %25 = tpu.matmul %23, %24, %cst_16 {dimension_numbers = #tpu.dot_dimension_numbers<[1], [0], [0], [1], [0, 0, 1, 1], [], []>} : vector<8x128xbf16>, vector<128x128xbf16>, vector<8x128xf32> -> vector<8x128xf32>
    %c0_17 = arith.constant 0 : index
    %c0_18 = arith.constant 0 : index
    %26 = vector.load %arg7[%c0_17, %c0_18] : memref<1x128xf32, #tpu.memory_space<vmem>>, vector<1x128xf32>
    %27 = vector.broadcast %26 : vector<1x128xf32> to vector<8x128xf32>
    %28 = arith.addf %25, %27 : vector<8x128xf32>
    %cst_19 = arith.constant 0.000000e+00 : f32
    %29 = vector.broadcast %cst_19 : f32 to vector<8x128xf32>
    %30 = arith.cmpf oge, %28, %29 : vector<8x128xf32>
    %cst_20 = arith.constant 2.000000e-01 : f32
    %31 = vector.broadcast %cst_20 : f32 to vector<8x128xf32>
    %32 = arith.mulf %31, %28 : vector<8x128xf32>
    %33 = arith.select %30, %28, %32 : vector<8x128xi1>, vector<8x128xf32>
    %34 = arith.truncf %33 : vector<8x128xf32> to vector<8x128xbf16>
    %c0_21 = arith.constant 0 : index
    %c0_22 = arith.constant 0 : index
    %35 = vector.load %arg8[%c0_21, %c0_22] : memref<128x256xbf16, #tpu.memory_space<vmem>>, vector<128x256xbf16>
    %cst_23 = arith.constant dense<0.000000e+00> : vector<8x256xf32>
    %36 = tpu.matmul %34, %35, %cst_23 {dimension_numbers = #tpu.dot_dimension_numbers<[1], [0], [0], [1], [0, 0, 1, 1], [], []>} : vector<8x128xbf16>, vector<128x256xbf16>, vector<8x256xf32> -> vector<8x256xf32>
    %c0_24 = arith.constant 0 : index
    %c0_25 = arith.constant 0 : index
    %37 = vector.load %arg9[%c0_24, %c0_25] : memref<1x256xf32, #tpu.memory_space<vmem>>, vector<1x256xf32>
    %38 = vector.broadcast %37 : vector<1x256xf32> to vector<8x256xf32>
    %39 = arith.addf %36, %38 : vector<8x256xf32>
    %c0_26 = arith.constant 0 : index
    %c0_27 = arith.constant 0 : index
    %40 = vector.load %arg10[%c0_26, %c0_27] : memref<8x256xf32, #tpu.memory_space<vmem>>, vector<8x256xf32>
    tpu.vector_store %arg10[%c0_26, %c0_27], %39 {strides = array<i32>} : memref<8x256xf32, #tpu.memory_space<vmem>>, vector<8x256xf32>,
    return
  }
  func.func @transform_0(%arg0: i32) -> (i32, i32) {
    %c0_i32 = arith.constant 0 : i32
    %c0_i32_0 = arith.constant 0 : i32
    return %arg0, %c0_i32 : i32, i32
  }
  func.func @transform_1(%arg0: i32) -> (i32, i32) {
    %c0_i32 = arith.constant 0 : i32
    %c0_i32_0 = arith.constant 0 : i32
    %c0_i32_1 = arith.constant 0 : i32
    return %c0_i32, %c0_i32_0 : i32, i32
  }
  func.func @transform_2(%arg0: i32) -> (i32, i32) {
    %c0_i32 = arith.constant 0 : i32
    %c0_i32_0 = arith.constant 0 : i32
    %c0_i32_1 = arith.constant 0 : i32
    return %c0_i32, %c0_i32_0 : i32, i32
  }
  func.func @transform_3(%arg0: i32) -> (i32, i32) {
    %c0_i32 = arith.constant 0 : i32
    %c0_i32_0 = arith.constant 0 : i32
    %c0_i32_1 = arith.constant 0 : i32
    return %c0_i32, %c0_i32_0 : i32, i32
  }
  func.func @transform_4(%arg0: i32) -> (i32, i32) {
    %c0_i32 = arith.constant 0 : i32
    %c0_i32_0 = arith.constant 0 : i32
    %c0_i32_1 = arith.constant 0 : i32
    return %c0_i32, %c0_i32_0 : i32, i32
  }
  func.func @transform_5(%arg0: i32) -> (i32, i32) {
    %c0_i32 = arith.constant 0 : i32
    %c0_i32_0 = arith.constant 0 : i32
    %c0_i32_1 = arith.constant 0 : i32
    return %c0_i32, %c0_i32_0 : i32, i32
  }
  func.func @transform_6(%arg0: i32) -> (i32, i32) {
    %c0_i32 = arith.constant 0 : i32
    %c0_i32_0 = arith.constant 0 : i32
    %c0_i32_1 = arith.constant 0 : i32
    return %c0_i32, %c0_i32_0 : i32, i32
  }
  func.func @transform_7(%arg0: i32) -> (i32, i32) {
    %c0_i32 = arith.constant 0 : i32
    %c0_i32_0 = arith.constant 0 : i32
    %c0_i32_1 = arith.constant 0 : i32
    return %c0_i32, %c0_i32_0 : i32, i32
  }
  func.func @transform_8(%arg0: i32) -> (i32, i32) {
    %c0_i32 = arith.constant 0 : i32
    %c0_i32_0 = arith.constant 0 : i32
    %c0_i32_1 = arith.constant 0 : i32
    return %c0_i32, %c0_i32_0 : i32, i32
  }
  func.func @transform_9(%arg0: i32) -> (i32, i32) {
    %c0_i32 = arith.constant 0 : i32
    %c0_i32_0 = arith.constant 0 : i32
    return %arg0, %c0_i32 : i32, i32
  }
}

</mosaic_0001>

<bundles_post_ra>
// kernel: decoder_vae_forward.1
= control target key start
LH: loop header
LB: loop body
LE: loop exit
PB: predicated region body
PF: predicated region fallthrough
CT: control target
= control target key end

     0   :  { %14 = vsyncpa [#allocation3], 0  ;;  %s1137_s0 = inlined_call_operand.hbm [shape: f32[8,32], index: 0, kind: input, shape index: {}]   ;;  %s1138_s1 = inlined_call_operand.vmem [shape: bf16[32,128], index: 1, kind: input, shape index: {}]   ;;  %s1139_s2 = inlined_call_operand.hbm [shape: f32[1,128], index: 2, kind: input, shape index: {}]   ;;  %s1140_s3 = inlined_call_operand.hbm [shape: bf16[128,128], index: 3, kind: input, shape index: {}]   ;;  %s1141_s4 = inlined_call_operand.hbm [shape: f32[1,128], index: 4, kind: input, shape index: {}]   ;;  %s1142_s5 = inlined_call_operand.hbm [shape: bf16[128,128], index: 5, kind: input, shape index: {}]   ;;  %s1143_s6 = inlined_call_operand.hbm [shape: f32[1,128], index: 6, kind: input, shape index: {}]   ;;  %s1144_s7 = inlined_call_operand.hbm [shape: bf16[128,256], index: 7, kind: input, shape index: {}]   ;;  %s1145_s8 = inlined_call_operand.vmem [shape: f32[1,256], index: 8, kind: input, shape index: {}]   ;;  %s1146_s9 = inlined_call_operand.hbm [shape: f32[8,256], index: 9, kind: output, shape index: {}]  }
   0x1   :  { %15 = vsyncpa [#allocation6], 0 }
   0x2   :  { %16 = vsyncpa [#allocation9], 0 }
   0x3   :  { %17 = vsyncpa [#allocation12], 0 }
   0x4   :  { %18 = vsyncpa [#allocation4], 0  ;;  %s943_s30 = smov [#allocation5]   ;;  %s944_s11 = smov [#allocation8]  }
   0x5   :  { %s37_s10 = sshll.u32 %s943_s30, 4  ;;  %s59_s12 = sshll.u32 %s944_s11, 4  ;;  %s38_s10 = int_to_ptr.vmem [resolvable:$true] %s37_s10  ;;  %s60_s12 = int_to_ptr.vmem [resolvable:$true] %s59_s12 }
   0x6   :  { %s757_s15 = scalar_lea.hbm %s1139_s2, 16 }
   0x7   :  { %p758_p0 = scmp.ne.s32.totalorder %s1139_s2, %s757_s15  ;;  %p761_p1 = scmp.lt.u32.totalorder %s757_s15, %s1139_s2 }
   0x9   :  { %p763_p2 = pnand %p761_p1, %p758_p0 }
   0xb   :  { %766 = shalt.err (!%p763_p2)
}
   0xc   :  { %s767_s20 = scalar_lea.vmem %s38_s10, 16  ;;  %s771_s21 = scalar_lea.vmem %s38_s10, 32 }
   0xd   :  { %p768_p3 = scmp.ne.s32.totalorder %s38_s10, %s767_s20  ;;  %p772_p4 = scmp.lt.s32.totalorder %s38_s10, %s38_s10 }
   0xe   :  { %p773_p5 = scmp.lt.s32.totalorder %s771_s21, %s767_s20 }
  0x10   :  { %p774_p6 = por %p773_p5, %p772_p4 }
  0x12   :  { %p775_p7 = pnand %p774_p6, %p768_p3 }
  0x14   :  { %778 = shalt.err (!%p775_p7)
}
  0x15   :  { %40 = dma.hbm_to_vmem [thread:$0]  %s1139_s2, 16, %s38_s10, [#allocation6]  }
  0x16   :  { %s779_s26 = scalar_lea.hbm %s1141_s4, 16 }
  0x17   :  { %p780_p8 = scmp.ne.s32.totalorder %s1141_s4, %s779_s26  ;;  %p783_p9 = scmp.lt.u32.totalorder %s779_s26, %s1141_s4 }
  0x19   :  { %p785_p10 = pnand %p783_p9, %p780_p8 }
  0x1b   :  { %788 = shalt.err (!%p785_p10)
}
  0x1c   :  { %s789_s11 = scalar_lea.vmem %s60_s12, 16  ;;  %s793_s13 = scalar_lea.vmem %s60_s12, 32 }
  0x1d   :  { %p790_p11 = scmp.ne.s32.totalorder %s60_s12, %s789_s11  ;;  %p794_p12 = scmp.lt.s32.totalorder %s60_s12, %s60_s12 }
  0x1e   :  { %p795_p13 = scmp.lt.s32.totalorder %s793_s13, %s789_s11 }
  0x20   :  { %p796_p0 = por %p795_p13, %p794_p12 }
  0x22   :  { %p797_p1 = pnand %p796_p0, %p790_p11 }
  0x24   :  { %800 = shalt.err (!%p797_p1)
}
  0x25   :  { %62 = dma.hbm_to_vmem [thread:$0]  %s1141_s4, 16, %s60_s12, [#allocation9]  }
  0x26   :  { %s945_s14 = smov [#allocation11]   ;;  %s946_s16 = smov [#allocation2]  }
  0x27   :  { %s81_s15 = sshll.u32 %s945_s14, 4  ;;  %s25_s17 = sshll.u32 %s946_s16, 4  ;;  %s82_s15 = int_to_ptr.vmem [resolvable:$true] %s81_s15  ;;  %s26_s17 = int_to_ptr.vmem [resolvable:$true] %s25_s17 }
  0x28   :  { %s801_s20 = scalar_lea.hbm %s1143_s6, 16 }
  0x29   :  { %p802_p2 = scmp.ne.s32.totalorder %s1143_s6, %s801_s20  ;;  %p805_p3 = scmp.lt.u32.totalorder %s801_s20, %s1143_s6 }
  0x2b   :  { %p807_p4 = pnand %p805_p3, %p802_p2 }
  0x2d   :  { %810 = shalt.err (!%p807_p4)
}
  0x2e   :  { %s811_s4 = scalar_lea.vmem %s82_s15, 16  ;;  %s815_s12 = scalar_lea.vmem %s82_s15, 32 }
  0x2f   :  { %p812_p5 = scmp.ne.s32.totalorder %s82_s15, %s811_s4  ;;  %p816_p6 = scmp.lt.s32.totalorder %s82_s15, %s82_s15 }
  0x30   :  { %p817_p7 = scmp.lt.s32.totalorder %s815_s12, %s811_s4 }
  0x32   :  { %p818_p8 = por %p817_p7, %p816_p6 }
  0x34   :  { %p819_p9 = pnand %p818_p8, %p812_p5 }
  0x36   :  { %822 = shalt.err (!%p819_p9)
}
  0x37   :  { %84 = dma.hbm_to_vmem [thread:$0]  %s1143_s6, 16, %s82_s15, [#allocation12]  }
  0x38   :  { %s823_s29 = scalar_lea.hbm %s1137_s0, 128 }
  0x39   :  { %p824_p10 = scmp.ne.s32.totalorder %s1137_s0, %s823_s29  ;;  %p827_p11 = scmp.lt.u32.totalorder %s823_s29, %s1137_s0 }
  0x3b   :  { %p829_p12 = pnand %p827_p11, %p824_p10 }
  0x3d   :  { %832 = shalt.err (!%p829_p12)
}
  0x3e   :  { %s833_s10 = scalar_lea.vmem %s26_s17, 128  ;;  %p838_p0 = scmp.lt.s32.totalorder %s26_s17, %s26_s17 }
  0x3f   :  { %p834_p13 = scmp.ne.s32.totalorder %s26_s17, %s833_s10  ;;  %p839_p1 = scmp.lt.s32.totalorder %s833_s10, %s833_s10 }
  0x41   :  { %p840_p2 = por %p839_p1, %p838_p0 }
  0x43   :  { %p841_p3 = pnand %p840_p2, %p834_p13 }
  0x45   :  { %844 = shalt.err (!%p841_p3)
}
  0x46   :  { %28 = dma.hbm_to_vmem [thread:$0]  %s1137_s0, 128, %s26_s17, [#allocation3]  }
  0x47   :  { %s947_s15 = smov [#allocation7]   ;;  %s845_s20 = scalar_lea.hbm %s1140_s3, 1024 }
  0x48   :  { %s46_s16 = sshll.u32 %s947_s15, 4  ;;  %p846_p4 = scmp.ne.s32.totalorder %s1140_s3, %s845_s20  ;;  %s47_s16 = int_to_ptr.vmem [resolvable:$true] %s46_s16 }
  0x49   :  { %p849_p5 = scmp.lt.u32.totalorder %s845_s20, %s1140_s3 }
  0x4b   :  { %p851_p6 = pnand %p849_p5, %p846_p4 }
  0x4d   :  { %854 = shalt.err (!%p851_p6)
}
  0x4e   :  { %s855_s4 = scalar_lea.vmem %s47_s16, 1024  ;;  %p860_p8 = scmp.lt.s32.totalorder %s47_s16, %s47_s16 }
  0x4f   :  { %p856_p7 = scmp.ne.s32.totalorder %s47_s16, %s855_s4  ;;  %p861_p9 = scmp.lt.s32.totalorder %s855_s4, %s855_s4 }
  0x51   :  { %p862_p10 = por %p861_p9, %p860_p8 }
  0x53   :  { %p863_p11 = pnand %p862_p10, %p856_p7 }
  0x55   :  { %866 = shalt.err (!%p863_p11)
}
  0x56   :  { %s948_s0 = smov 64   ;;  %s949_s17 = smov 4  }
  0x57   :  { %52 = dma.hbm_to_vmem [thread:$0]  %s1140_s3, 1024, %s47_s16, [#allocation6], %s948_s0, %s948_s0, %s949_s17  }
  0x58   :  { %s950_s26 = smov [#allocation10]   ;;  %s951_s28 = smov [#allocation13]  }
  0x59   :  { %s68_s27 = sshll.u32 %s950_s26, 4  ;;  %s90_s29 = sshll.u32 %s951_s28, 4  ;;  %s69_s27 = int_to_ptr.vmem [resolvable:$true] %s68_s27  ;;  %s91_s29 = int_to_ptr.vmem [resolvable:$true] %s90_s29 }
  0x5a   :  { %s867_s13 = scalar_lea.hbm %s1142_s5, 1024 }
  0x5b   :  { %p868_p12 = scmp.ne.s32.totalorder %s1142_s5, %s867_s13  ;;  %p871_p13 = scmp.lt.u32.totalorder %s867_s13, %s1142_s5 }
  0x5d   :  { %p873_p0 = pnand %p871_p13, %p868_p12 }
  0x5f   :  { %876 = shalt.err (!%p873_p0)
}
  0x60   :  { %s877_s3 = scalar_lea.vmem %s69_s27, 1024  ;;  %p882_p2 = scmp.lt.s32.totalorder %s69_s27, %s69_s27 }
  0x61   :  { %p878_p1 = scmp.ne.s32.totalorder %s69_s27, %s877_s3  ;;  %p883_p3 = scmp.lt.s32.totalorder %s877_s3, %s877_s3 }
  0x63   :  { %p884_p4 = por %p883_p3, %p882_p2 }
  0x65   :  { %p885_p5 = pnand %p884_p4, %p878_p1 }
  0x67   :  { %888 = shalt.err (!%p885_p5)
}
  0x68   :  { %74 = dma.hbm_to_vmem [thread:$0]  %s1142_s5, 1024, %s69_s27, [#allocation9], %s948_s0, %s948_s0, %s949_s17  }
  0x69   :  { %s889_s20 = scalar_lea.hbm %s1144_s7, 2048 }
  0x6a   :  { %p890_p6 = scmp.ne.s32.totalorder %s1144_s7, %s889_s20  ;;  %p893_p7 = scmp.lt.u32.totalorder %s889_s20, %s1144_s7 }
  0x6c   :  { %p895_p8 = pnand %p893_p7, %p890_p6 }
  0x6e   :  { %898 = shalt.err (!%p895_p8)
}
  0x6f   :  { %s899_s4 = scalar_lea.vmem %s91_s29, 2048  ;;  %p904_p10 = scmp.lt.s32.totalorder %s91_s29, %s91_s29 }
  0x70   :  { %p900_p9 = scmp.ne.s32.totalorder %s91_s29, %s899_s4  ;;  %p905_p11 = scmp.lt.s32.totalorder %s899_s4, %s899_s4 }
  0x72   :  { %p906_p12 = por %p905_p11, %p904_p10 }
  0x74   :  { %p907_p13 = pnand %p906_p12, %p900_p9 }
  0x76   :  { %910 = shalt.err (!%p907_p13)
}
  0x77   :  { %s952_s5 = smov 128   ;;  %s953_s0 = smov 8  }
  0x78   :  { %96 = dma.hbm_to_vmem [thread:$0]  %s1144_s7, 2048, %s91_s29, [#allocation12], %s952_s5, %s952_s5, %s953_s0  }
  0x79   :  { %933 = dma.done.wait [#allocation3], 128  }
  0x7a   :  { %934 = vsyncadd [#allocation3], 4294967168 }
  0x7b   :  { %935 = dma.done.wait [#allocation6], 1040  }
  0x7c   :  { %936 = vsyncadd [#allocation6], 4294966256 }
  0x7d   :  { %937 = dma.done.wait [#allocation9], 1040  }
  0x7e   :  { %938 = vsyncadd [#allocation9], 4294966256 }
  0x7f   :  { %939 = dma.done.wait [#allocation12], 2064  }
  0x80   :  { %940 = vsyncadd [#allocation12], 4294965232  ;;  %v954_v0 = vmov 0.0   ;;  %vm955_vm0 = vmmov 0   ;;  %v715_v1 = vld [vmem:[%s1138_s1] sm:$0xff]   ;;  %v716_v2 = vld [vmem:[%s1138_s1 + $0x8] sm:$0xff]  }
  0x81   :  { %652 = vmatprep.subr.bf16.mxu0 %v954_v0  ;;  %656 = vmatprep.mubr.msk.bf16.mxu0 %vm955_vm0, %v954_v0  ;;  %v121_v3 = vld [vmem:[#allocation2] sm:$0xff]  ;;  %v717_v4 = vld [vmem:[#allocation7] sm:$0xff]   ;;  %v718_v6 = vld [vmem:[#allocation7 + $0x8] sm:$0xff]   ;;  %vm146_vm1 = vcmask 261120   ;;  %v956_v55 = vmov 0   ;;  %s957_s29 = smov [#allocation14]  }
  0x82   :  { %660 = vmatprep.subr.bf16.mxu1 %v954_v0  ;;  %676 = vmatprep.mubr.msk.bf16.mxu1 %vm955_vm0, %v954_v0  ;;  %v122_v5 = vpack.c.bf16 %v121_v3, %v121_v3  ;;  %v719_v7 = vld [vmem:[#allocation7 + $0x10] sm:$0xff]   ;;  %v720_v8 = vld [vmem:[#allocation7 + $0x18] sm:$0xff]   ;;  %v721_v9 = vld [vmem:[#allocation7 + $0x20] sm:$0xff]   ;;  %s581_s30 = sshll.u32 %s957_s29, 4  ;;  %s582_s30 = int_to_ptr.vmem [resolvable:$true] %s581_s30 }
  0x83   :  { %653 = vmatpush3.bf16.msra.mxu0 %v715_v1  ;;  %661 = vmatpush3.bf16.msra.mxu1 %v717_v4  ;;  %v722_v10 = vld [vmem:[#allocation7 + $0x28] sm:$0xff]   ;;  %v723_v11 = vld [vmem:[#allocation7 + $0x30] sm:$0xff]   ;;  %v724_v12 = vld [vmem:[#allocation7 + $0x38] sm:$0xff]   ;;  %v442_v1 = vlaneseq  ;;  %s911_s11 = scalar_lea.vmem %s582_s30, 256  ;;  %p916_p1 = scmp.lt.s32.totalorder %s582_s30, %s582_s30 }
  0x84   :  { %654 = vmatprep.subr.bf16.mxu0 %v954_v0  ;;  %662 = vmatprep.subr.bf16.mxu1 %v954_v0  ;;  %v725_v13 = vld [vmem:[#allocation10] sm:$0xff]   ;;  %v726_v14 = vld [vmem:[#allocation10 + $0x8] sm:$0xff]   ;;  %v727_v15 = vld [vmem:[#allocation10 + $0x10] sm:$0xff]   ;;  %p912_p0 = scmp.ne.s32.totalorder %s582_s30, %s911_s11  ;;  %p917_p2 = scmp.lt.s32.totalorder %s911_s11, %s911_s11 }
  0x85   :  { %v728_v16 = vld [vmem:[#allocation10 + $0x18] sm:$0xff]   ;;  %v729_v17 = vld [vmem:[#allocation10 + $0x20] sm:$0xff]   ;;  %v730_v18 = vld [vmem:[#allocation10 + $0x28] sm:$0xff]  }
  0x86   :  { %v593_v19 = vld [vmem:[#allocation5] ss:$0 sm:$0xff]  ;;  %v731_v28 = vld [vmem:[#allocation10 + $0x30] sm:$0xff]   ;;  %v733_v30 = vld [vmem:[#allocation13] ss:$8 sps:$4 sm:$0xff]   ;;  %p918_p3 = por %p917_p2, %p916_p1 }
  0x87   :  { %655 = vmatpush3.bf16.msra.mxu0 %v716_v2  ;;  %663 = vmatpush3.bf16.msra.mxu1 %v718_v6  ;;  %v732_v29 = vld [vmem:[#allocation10 + $0x38] sm:$0xff]   ;;  %v735_v31 = vld [vmem:[#allocation13 + $0x4] ss:$8 sps:$4 sm:$0xff]   ;;  %v739_v35 = vld [vmem:[#allocation13 + $0x20] ss:$8 sps:$4 sm:$0xff]   ;;  %v443_v2 = vshrl.u32 %v442_v1, 7 }
  0x88   :  { %680 = vmatprep.subr.bf16.mxu0 %v954_v0  ;;  %664 = vmatprep.subr.bf16.mxu1 %v954_v0  ;;  %v738_v32 = vld [vmem:[#allocation13 + $0x14] ss:$8 sps:$4 sm:$0xff]   ;;  %v736_v33 = vld [vmem:[#allocation13 + $0x10] ss:$8 sps:$4 sm:$0xff]   ;;  %v741_v34 = vld [vmem:[#allocation13 + $0x24] ss:$8 sps:$4 sm:$0xff]   ;;  %p919_p4 = pnand %p918_p3, %p912_p0 }
  0x89   :  { %v744_v36 = vld [vmem:[#allocation13 + $0x34] ss:$8 sps:$4 sm:$0xff]   ;;  %v742_v37 = vld [vmem:[#allocation13 + $0x30] ss:$8 sps:$4 sm:$0xff]   ;;  %v747_v38 = vld [vmem:[#allocation13 + $0x44] ss:$8 sps:$4 sm:$0xff]  }
  0x8a   :  { %657 = vmatmul.mubr.msk.bf16.vlgmr.msra.gmra.mrb[0].mxu0 %vm146_vm1, %v122_v5  ;;  %v745_v39 = vld [vmem:[#allocation13 + $0x40] ss:$8 sps:$4 sm:$0xff]   ;;  %v750_v40 = vld [vmem:[#allocation13 + $0x54] ss:$8 sps:$4 sm:$0xff]   ;;  %v748_v41 = vld [vmem:[#allocation13 + $0x50] ss:$8 sps:$4 sm:$0xff]  }
  0x8b   :  { %696 = vmatprep.mubr.msk.bf16.mxu0 %vm955_vm0, %v954_v0  ;;  %665 = vmatpush3.bf16.msra.mxu1 %v719_v7  ;;  %v597_v42 = vld [vmem:[#allocation8] ss:$0 sm:$0xff]  ;;  %v753_v51 = vld [vmem:[#allocation13 + $0x64] ss:$8 sps:$4 sm:$0xff]   ;;  %v751_v52 = vld [vmem:[#allocation13 + $0x60] ss:$8 sps:$4 sm:$0xff]  }
  0x8c   :  { %666 = vmatprep.subr.bf16.mxu1 %v954_v0  ;;  %681 = vmatpush3.bf16.msra.mxu0 %v725_v13  ;;  %v756_v53 = vld [vmem:[#allocation13 + $0x74] ss:$8 sps:$4 sm:$0xff]   ;;  %v754_v54 = vld [vmem:[#allocation13 + $0x70] ss:$8 sps:$4 sm:$0xff]   ;;  %v444_v3 = vsub.s32 0, %v443_v2  ;;  %v448_v5 = vsub.s32 1, %v443_v2 }
  0x8d   :  { %682 = vmatprep.subr.bf16.mxu0 %v954_v0  ;;  %v606_v56 = vld [vmem:[#allocation11] ss:$0 sm:$0xff]  ;;  %v440_v4 = vld [vmem:[%s1145_s8] sm:$0x3] }
  0x8e   :  { %v445_v6 = vrot.slane %v440_v4, %v444_v3  ;;  %v449_v7 = vrot.slane %v440_v4, %v448_v5 }
  0x8f   :  { %667 = vmatpush3.bf16.msra.mxu1 %v720_v8 }
  0x90   :  { %668 = vmatprep.subr.bf16.mxu1 %v954_v0  ;;  %683 = vmatpush3.bf16.msra.mxu0 %v726_v14 }
  0x91   :  { %684 = vmatprep.subr.bf16.mxu0 %v954_v0 }
  0x93   :  { %669 = vmatpush3.bf16.msra.mxu1 %v721_v9 }
  0x94   :  { %670 = vmatprep.subr.bf16.mxu1 %v954_v0  ;;  %685 = vmatpush3.bf16.msra.mxu0 %v727_v15 }
  0x95   :  { %686 = vmatprep.subr.bf16.mxu0 %v954_v0 }
  0x97   :  { %671 = vmatpush3.bf16.msra.mxu1 %v722_v10 }
  0x98   :  { %672 = vmatprep.subr.bf16.mxu1 %v954_v0  ;;  %687 = vmatpush3.bf16.msra.mxu0 %v728_v16 }
  0x99   :  { %688 = vmatprep.subr.bf16.mxu0 %v954_v0 }
  0x9b   :  { %673 = vmatpush3.bf16.msra.mxu1 %v723_v11 }
  0x9c   :  { %674 = vmatprep.subr.bf16.mxu1 %v954_v0  ;;  %689 = vmatpush3.bf16.msra.mxu0 %v729_v17 }
  0x9d   :  { %690 = vmatprep.subr.bf16.mxu0 %v954_v0 }
  0x9f   :  { %675 = vmatpush3.bf16.msra.mxu1 %v724_v12 }
  0xa0   :  { %691 = vmatpush3.bf16.msra.mxu0 %v730_v18  ;;  %532 = vmatprep.subr.bf16.mxu1 %v735_v31 }
  0xa1   :  { %692 = vmatprep.subr.bf16.mxu0 %v954_v0 }
  0xa4   :  { %693 = vmatpush3.bf16.msra.mxu0 %v731_v28 }
  0xa5   :  { %694 = vmatprep.subr.bf16.mxu0 %v954_v0 }
  0xa8   :  { %695 = vmatpush3.bf16.msra.mxu0 %v732_v29 }
 0x15d   :  { %v184_v20 = vpop.f32.mrb[0].mxu0 }
 0x15e   :  { %v185_v21 = vadd.f32 %v593_v19, %v184_v20  ;;  %v658_v22 = vpop.f32.mrb[1].mxu0 }
 0x15f   :  { %v187_v23 = vpop.f32.mrb[2].mxu0 }
 0x160   :  { %vm190_vm2 = vcmp.ge.f32.partialorder %v185_v21, 0.0  ;;  %v191_v24 = vmul.f32 0.2, %v185_v21  ;;  %v659_v25 = vpop.f32.mrb[3].mxu0 }
 0x162   :  { %v192_v26 = vsel %vm190_vm2, %v185_v21, %v191_v24 }
 0x163   :  { %v193_v27 = vpack.c.bf16 %v192_v26, %v192_v26 }
 0x165   :  { %677 = vmatmul.mubr.bf16.vlgmr.msra.gmra.mrb[0].mxu1 %v193_v27 }
 0x166   :  { %533 = vmatpush1.bf16.msra.mxu1 %v733_v30  ;;  %564 = vmatprep.mubr.bf16.mxu1 %v956_v55 }
 0x167   :  { %534 = vmatprep.subr.bf16.mxu1 %v738_v32 }
 0x16a   :  { %535 = vmatpush1.bf16.msra.mxu1 %v736_v33 }
 0x16b   :  { %536 = vmatprep.subr.bf16.mxu1 %v741_v34 }
 0x16e   :  { %537 = vmatpush1.bf16.msra.mxu1 %v739_v35 }
 0x16f   :  { %538 = vmatprep.subr.bf16.mxu1 %v744_v36 }
 0x172   :  { %539 = vmatpush1.bf16.msra.mxu1 %v742_v37 }
 0x173   :  { %540 = vmatprep.subr.bf16.mxu1 %v747_v38 }
 0x176   :  { %541 = vmatpush1.bf16.msra.mxu1 %v745_v39 }
 0x177   :  { %542 = vmatprep.subr.bf16.mxu1 %v750_v40 }
 0x17a   :  { %543 = vmatpush1.bf16.msra.mxu1 %v748_v41 }
 0x17b   :  { %544 = vmatprep.subr.bf16.mxu1 %v753_v51 }
 0x17e   :  { %545 = vmatpush1.bf16.msra.mxu1 %v751_v52 }
 0x17f   :  { %546 = vmatprep.subr.bf16.mxu1 %v756_v53 }
 0x182   :  { %547 = vmatpush1.bf16.msra.mxu1 %v754_v54 }
 0x238   :  { %v299_v43 = vpop.f32.mrb[0].mxu1 }
 0x239   :  { %v300_v44 = vadd.f32 %v597_v42, %v299_v43  ;;  %v678_v45 = vpop.f32.mrb[1].mxu1 }
 0x23a   :  { %v302_v46 = vpop.f32.mrb[2].mxu1 }
 0x23b   :  { %vm305_vm3 = vcmp.ge.f32.partialorder %v300_v44, 0.0  ;;  %v306_v47 = vmul.f32 0.2, %v300_v44  ;;  %v679_v48 = vpop.f32.mrb[3].mxu1 }
 0x23d   :  { %v307_v49 = vsel %vm305_vm3, %v300_v44, %v306_v47 }
 0x23e   :  { %v308_v50 = vpack.c.bf16 %v307_v49, %v307_v49 }
 0x240   :  { %697 = vmatmul.mubr.bf16.vlgmr.msra.gmra.mrb[4].mxu0 %v308_v50 }
 0x313   :  { %v414_v57 = vpop.f32.mrb[4].mxu0 }
 0x314   :  { %v415_v58 = vadd.f32 %v606_v56, %v414_v57  ;;  %v698_v59 = vpop.f32.mrb[5].mxu0 }
 0x315   :  { %v417_v60 = vpop.f32.mrb[6].mxu0 }
 0x316   :  { %vm420_vm4 = vcmp.ge.f32.partialorder %v415_v58, 0.0  ;;  %v421_v61 = vmul.f32 0.2, %v415_v58  ;;  %v699_v62 = vpop.f32.mrb[7].mxu0 }
 0x318   :  { %v422_v63 = vsel %vm420_vm4, %v415_v58, %v421_v61 }
 0x319   :  { %v423_v0 = vpack.c.bf16 %v422_v63, %v422_v63 }
 0x31b   :  { %565 = vmatmul.mubr.bf16.vlgmr.msra.gmra.mrb[4].mxu1 %v423_v0 }
 0x3ee   :  { %v566_v8 = vpop.f32.mrb[4].mxu1 }
 0x3ef   :  { %v567_v9 = vadd.f32 %v566_v8, %v445_v6  ;;  %v568_v10 = vpop.f32.mrb[5].mxu1 }
 0x3f0   :  { %v569_v11 = vadd.f32 %v568_v10, %v449_v7  ;;  %v570_v12 = vpop.f32.mrb[6].mxu1 }
 0x3f1   :  { %573 = vst [vmem:[#allocation14] sm:$0xff] %v567_v9  ;;  %v571_v13 = vpop.f32.mrb[7].mxu1 }
 0x3f2   :  { %574 = vst [vmem:[#allocation14 + $0x8] sm:$0xff] %v569_v11 }
 0x3f3   :  { %922 = shalt.err (!%p919_p4)
}
 0x3f4   :  { %s923_s2 = scalar_lea.hbm %s1146_s9, 256 }
 0x3f5   :  { %p924_p5 = scmp.ne.s32.totalorder %s1146_s9, %s923_s2  ;;  %p927_p6 = scmp.lt.u32.totalorder %s923_s2, %s1146_s9 }
 0x3f7   :  { %p929_p7 = pnand %p927_p6, %p924_p5 }
 0x3f9   :  { %932 = shalt.err (!%p929_p7)
}
 0x3fa   :  { %584 = dma.vmem_to_hbm [thread:$0]  %s582_s30, 256, %s1146_s9, [#allocation4]  }
 0x3fb   :  { %941 = dma.done.wait [#allocation4], 256  }
 0x3fc   :  { %942 = vsyncadd [#allocation4], 4294967040 }
 0x3fd   :  { %588 = vsyncpa [#allocation3], 1 }
 0x3fe   :  { %589 = vsyncpa [#allocation6], 1 }
 0x3ff   :  { %590 = vsyncpa [#allocation9], 1 }
 0x400   :  { %591 = vsyncpa [#allocation12], 1 }
 0x401   :  { %592 = vsyncpa [#allocation4], 1 }

</bundles_post_ra>
